<compile_context>
chip_gen: v7x
topology: tpu7x:2x2x1
jax: 0.10.0
libtpu: 0.0.40
codegen_flags: <defaults>
</compile_context>

<pallas_src>
import math

import jax
import jax.numpy as jnp
from jax.experimental import pallas as pl
from jax.experimental.pallas import tpu as pltpu


def make_pe_table(max_len: int, d_model: int, dtype=jnp.float32) -> jnp.ndarray:
    """Deterministic sin/cos positional-encoding table, shape (max_len, d_model)."""
    position = jnp.arange(max_len, dtype=jnp.float32)[:, None]            # (L, 1)
    div_term = jnp.exp(
        jnp.arange(0, d_model, 2, dtype=jnp.float32) * (-math.log(10000.0) / d_model)
    )                                                                     # (ceil(D/2),)
    angles = position * div_term                                          # (L, ceil(D/2))
    pe = jnp.zeros((max_len, d_model), dtype=jnp.float32)
    pe = pe.at[:, 0::2].set(jnp.sin(angles))
    pe = pe.at[:, 1::2].set(jnp.cos(angles[:, : d_model // 2]))           # odd-D safe
    return pe.astype(dtype)


# ---------------------------------------------------------------------------
# Kernels
# ---------------------------------------------------------------------------

def _add_kernel(x_ref, pe_ref, o_ref):
    # x_ref block: (rows, cols); pe_ref block: (1, cols) -> broadcast over rows.
    o_ref[...] = (x_ref[...] + pe_ref[...]).astype(o_ref.dtype)


def _make_dropout_kernel_hw(keep_prob: float):
    """Broadcast-add of pe + inverted dropout using the TPU hardware PRNG."""
    inv_keep = 1.0 / keep_prob
    # Keep an element iff its 31-bit uniform value < thresh.
    thresh = min(int(keep_prob * (1 << 31)), (1 << 31) - 1)

    def kernel(seed_ref, x_ref, pe_ref, o_ref):
        y = x_ref[...] + pe_ref[...]
        # Distinct hardware-PRNG stream per (seed, tile).
        # TODO(synk): not bit-compatible with torch.nn.Dropout's RNG stream.
        pltpu.prng_seed(seed_ref[0], pl.program_id(0), pl.program_id(1))
        bits = pltpu.prng_random_bits(y.shape)
        if bits.dtype != jnp.uint32:
            bits = pltpu.bitcast(bits, jnp.uint32)
        r31 = bits >> jnp.uint32(1)                       # uniform in [0, 2^31)
        keep = r31 < jnp.uint32(thresh)
        scale = jnp.asarray(inv_keep, y.dtype)            # stay in native dtype
        o_ref[...] = jnp.where(keep, y * scale, jnp.zeros_like(y)).astype(o_ref.dtype)

    return kernel


def _make_dropout_kernel_hash(keep_prob: float, block_rows: int, block_cols: int,
                              row_len: int):
    """Fallback (non-TPU / interpret mode): counter-hash PRNG in plain jnp ops."""
    inv_keep = 1.0 / keep_prob
    thresh = min(int(keep_prob * (1 << 31)), (1 << 31) - 1)

    def kernel(seed_ref, x_ref, pe_ref, o_ref):
        y = x_ref[...] + pe_ref[...]
        # grid = (col_blocks, row_blocks): axis 0 -> columns, axis 1 -> rows.
        row0 = pl.program_id(1) * block_rows
        col0 = pl.program_id(0) * block_cols
        # Fold all per-tile scalars into one offset (computed once on the scalar unit).
        # NOTE: int32 index math wraps for B*S*D > 2^31; only hash-stream
        # independence degrades, not uniformity.
        k = (
            (row0 * jnp.int32(row_len) + col0).astype(jnp.uint32)
            + seed_ref[0].astype(jnp.uint32) * jnp.uint32(0x9E3779B9)
        )
        r = jax.lax.broadcasted_iota(jnp.int32, y.shape, 0)
        c = jax.lax.broadcasted_iota(jnp.int32, y.shape, 1)
        h = (r * jnp.int32(row_len) + c).astype(jnp.uint32) + k
        # Reduced murmur-style mix (dropout does not need full avalanche).
        # TODO(synk): not bit-compatible with torch.nn.Dropout's RNG stream.
        h = h ^ (h >> jnp.uint32(16))
        h = h * jnp.uint32(0x85EBCA6B)
        h = h ^ (h >> jnp.uint32(13))
        h = h * jnp.uint32(0xC2B2AE35)
        h = h ^ (h >> jnp.uint32(16))
        keep = (h >> jnp.uint32(1)) < jnp.uint32(thresh)
        scale = jnp.asarray(inv_keep, y.dtype)
        o_ref[...] = jnp.where(keep, y * scale, jnp.zeros_like(y)).astype(o_ref.dtype)

    return kernel


# ---------------------------------------------------------------------------
# Wrapper helpers
# ---------------------------------------------------------------------------

def _device_kind() -> str:
    try:
        return jax.devices()[0].device_kind.lower()
    except Exception:
        return ""


def _is_tpu() -> bool:
    try:
        return jax.devices()[0].platform == "tpu"
    except Exception:
        return False


def _budgets():
    """(target block bytes, vmem_limit_bytes) tuned per TPU generation."""
    kind = _device_kind()
    if "v5" in kind or "v6" in kind:          # 128 MiB physical VMEM
        return 4 * 1024 * 1024, 64 * 1024 * 1024
    # v7x (64 MiB physical) or unknown: stay conservative.
    return 2 * 1024 * 1024, 32 * 1024 * 1024


def _choose_block(rows: int, cols: int, itemsize: int, target_bytes: int):
    """Pick a lane-dense block under the budget, respecting the (sublane, 128)
    tiling rule: each block dim divides the array dim and is a multiple of the
    packing factor / 128, or equals the full dim."""
    target_elems = max(128, target_bytes // itemsize)
    # Sub-32-bit dtypes pack along sublanes: 8 rows for f32, 16 for bf16, 32 for int8.
    row_mult = max(8, 32 // max(1, itemsize))

    # Column tile (lane axis): full row if it fits, else the largest multiple of
    # 128 that divides `cols` and stays under budget.
    if cols <= target_elems or cols % 128 != 0:
        block_cols = cols
    else:
        block_cols = cols
        cap = (min(cols, target_elems) // 128) * 128
        for cand in range(cap, 0, -128):
            if cols % cand == 0:
                block_cols = cand
                break

    # Row tile (sublane axis).
    if rows * block_cols <= target_elems or rows % row_mult != 0:
        block_rows = rows
    else:
        block_rows = rows
        cap_r = max(row_mult, (target_elems // block_cols) // row_mult * row_mult)
        for cand in range(cap_r, 0, -row_mult):
            if rows % cand == 0:
                block_rows = cand
                break

    # Guarantee >= 2 blocks on a parallel axis so megacore (v7x's two
    # TensorCores) can actually shard the work.
    n_blocks = pl.cdiv(rows, block_rows) * pl.cdiv(cols, block_cols)
    if n_blocks < 2 and cols % 128 == 0 and cols >= 256:
        for cand in range((cols // 2) // 128 * 128, 0, -128):
            if cols % cand == 0:
                block_cols = cand
                break

    return block_rows, block_cols


# ---------------------------------------------------------------------------
# Public wrapper
# ---------------------------------------------------------------------------

def positional_encoding(
    x: jnp.ndarray,
    pe_table: jnp.ndarray,
    *,
    dropout_p: float = 0.1,
    training: bool = False,
    seed: int = 0,
    min_pallas_bytes: int = 512 * 1024,
) -> jnp.ndarray:
    """x: (B, S, D).  pe_table: (max_len, D) with max_len >= S.

    NOTE: `seed` fixes the dropout mask; callers must thread a fresh seed per
    training step."""
    B, S, D = x.shape
    assert pe_table.shape[0] >= S and pe_table.shape[1] == D

    use_dropout = training and dropout_p > 0.0
    if use_dropout and dropout_p >= 1.0:          # nn.Dropout(p=1.0) -> all zeros
        return jnp.zeros_like(x)

    L = S * D
    itemsize = jnp.dtype(x.dtype).itemsize

    # Small-input fast path: a pallas_call's fixed launch/DMA-setup cost dwarfs
    # a few KiB of elementwise work; let XLA fuse it instead.
    if B * L * itemsize < min_pallas_bytes:
        y = x + pe_table[None, :S, :].astype(x.dtype)
        if use_dropout:
            keep = jax.random.bernoulli(jax.random.PRNGKey(int(seed)),
                                        1.0 - float(dropout_p), x.shape)
            y = jnp.where(keep, y / (1.0 - float(dropout_p)), 0.0).astype(x.dtype)
        return y

    # Lane-dense layout: (B, S*D) so the last block dim is a big multiple of 128.
    x2 = x.reshape(B, L)
    # TODO(synk): callers running this every step should cache pe already in x.dtype.
    pe2 = pe_table[:S, :].astype(x.dtype).reshape(1, L)

    target_bytes, vmem_limit = _budgets()
    block_rows, block_cols = _choose_block(B, L, itemsize, target_bytes)
    n_row_blocks = pl.cdiv(B, block_rows)
    n_col_blocks = pl.cdiv(L, block_cols)
    # Row/batch axis innermost: pe's block index (0, j) is constant across the
    # inner sweep, so pe is DMA'd from HBM exactly once per column block.
    grid = (n_col_blocks, n_row_blocks)

    compiler_params = pltpu.CompilerParams(
        # Pure elementwise -> all tiles independent; both axes parallel lets
        # v7x shard the grid across its two TensorCores.
        dimension_semantics=("parallel", "parallel"),
        vmem_limit_bytes=vmem_limit,
    )
    out_shape = jax.ShapeDtypeStruct((B, L), x.dtype)

    if not use_dropout:
        # Inference path: no seed / no scalar prefetch at all.
        grid_spec = pltpu.PrefetchScalarGridSpec(
            num_scalar_prefetch=0,
            grid=grid,
            in_specs=[
                pl.BlockSpec((block_rows, block_cols), lambda j, i: (i, j)),
                pl.BlockSpec((1, block_cols), lambda j, i: (0, j)),
            ],
            out_specs=pl.BlockSpec((block_rows, block_cols), lambda j, i: (i, j)),
        )
        out2 = pl.pallas_call(
            _add_kernel,
            out_shape=out_shape,
            grid_spec=grid_spec,
            compiler_params=compiler_params,
        )(x2, pe2)
    else:
        keep_prob = 1.0 - float(dropout_p)
        if _is_tpu():
            kernel = _make_dropout_kernel_hw(keep_prob)
        else:
            kernel = _make_dropout_kernel_hash(keep_prob, block_rows, block_cols, L)
        seed_arr = jnp.array([int(seed) % (1 << 31)], dtype=jnp.int32)   # non-negative
        grid_spec = pltpu.PrefetchScalarGridSpec(
            num_scalar_prefetch=1,                 # seed lands in SMEM
            grid=grid,
            in_specs=[
                pl.BlockSpec((block_rows, block_cols), lambda j, i, s: (i, j)),
                pl.BlockSpec((1, block_cols), lambda j, i, s: (0, j)),
            ],
            out_specs=pl.BlockSpec((block_rows, block_cols), lambda j, i, s: (i, j)),
        )
        out2 = pl.pallas_call(
            kernel,
            out_shape=out_shape,
            grid_spec=grid_spec,
            compiler_params=compiler_params,
        )(seed_arr, x2, pe2)

    return out2.reshape(B, S, D)


if __name__ == "__main__":
    MAX_LEN = 5000

    # --- Small shape (B=2, S=8, D=32), forced through the Pallas path. ---
    B, S, D = 2, 8, 32
    key = jax.random.PRNGKey(0)
    x = jax.random.normal(key, (B, S, D), dtype=jnp.float32)
    pe = make_pe_table(MAX_LEN, D, dtype=jnp.float32)
    ref = x + pe[None, :S, :]

    out_eval = jax.block_until_ready(
        positional_encoding(x, pe, dropout_p=0.1, training=False, min_pallas_bytes=0)
    )
    assert out_eval.shape == (B, S, D)
    assert jnp.allclose(out_eval, ref, atol=1e-6, rtol=1e-6)

    # Small-input XLA fast path agrees with the kernel (eval mode is exact).
    out_fast = jax.block_until_ready(
        positional_encoding(x, pe, dropout_p=0.1, training=False)
    )
    assert jnp.allclose(out_fast, ref, atol=1e-6, rtol=1e-6)

    # Training mode: inverted dropout (hardware PRNG on TPU).
    p = 0.1
    out_train = jax.block_until_ready(
        positional_encoding(x, pe, dropout_p=p, training=True, seed=42, min_pallas_bytes=0)
    )
    assert out_train.shape == (B, S, D)
    assert bool(jnp.all(jnp.isfinite(out_train)))
    dropped = out_train == 0.0
    scaled_ref = ref / (1.0 - p)
    # Every surviving element equals (x + pe) / keep_prob; some elements drop.
    assert bool(jnp.all(dropped | jnp.isclose(out_train, scaled_ref, atol=1e-5, rtol=1e-5)))
    frac = float(jnp.mean(dropped.astype(jnp.float32)))
    assert 0.0 < frac < 0.5, f"unexpected drop fraction {frac}"

    # --- Slightly larger shape to exercise a multi-block grid (megacore split). ---
    B2, S2, D2 = 16, 32, 128
    x_big = jax.random.normal(jax.random.PRNGKey(1), (B2, S2, D2), dtype=jnp.float32)
    pe_big = make_pe_table(MAX_LEN, D2, dtype=jnp.float32)
    ref_big = x_big + pe_big[None, :S2, :]
    out_big = jax.block_until_ready(
        positional_encoding(x_big, pe_big, dropout_p=0.1, training=False, min_pallas_bytes=0)
    )
    assert jnp.allclose(out_big, ref_big, atol=1e-6, rtol=1e-6)

    print("KERNEL_OK")
</pallas_src>

<mosaic_0001>
module attributes {stable_mosaic.version = 11 : i64} {
  func.func @_add_kernel(%arg0: i32, %arg1: i32, %arg2: memref<2x128xf32, #tpu.memory_space<vmem>>, %arg3: memref<1x128xf32, #tpu.memory_space<vmem>>, %arg4: memref<2x128xf32, #tpu.memory_space<vmem>>) attributes {dimension_semantics = [#tpu.dimension_semantics<parallel>, #tpu.dimension_semantics<parallel>], iteration_bounds = array<i64: 2, 1>, scalar_prefetch = 0 : i64, scratch_operands = 0 : i64, tpu.core_type = #tpu.core_type<tc>, window_params = [{transform_indices = @transform_0, window_bounds = array<i64: 2, 128>}, {transform_indices = @transform_1, window_bounds = array<i64: 1, 128>}, {transform_indices = @transform_2, window_bounds = array<i64: 2, 128>}]} {
    %c0 = arith.constant 0 : index
    %c0_0 = arith.constant 0 : index
    %0 = vector.load %arg2[%c0, %c0_0] : memref<2x128xf32, #tpu.memory_space<vmem>>, vector<2x128xf32>
    %c0_1 = arith.constant 0 : index
    %c0_2 = arith.constant 0 : index
    %1 = vector.load %arg3[%c0_1, %c0_2] : memref<1x128xf32, #tpu.memory_space<vmem>>, vector<1x128xf32>
    %2 = vector.broadcast %1 : vector<1x128xf32> to vector<2x128xf32>
    %3 = arith.addf %0, %2 : vector<2x128xf32>
    %c0_3 = arith.constant 0 : index
    %c0_4 = arith.constant 0 : index
    %4 = vector.load %arg4[%c0_3, %c0_4] : memref<2x128xf32, #tpu.memory_space<vmem>>, vector<2x128xf32>
    tpu.vector_store %arg4[%c0_3, %c0_4], %3 {strides = array<i32>} : memref<2x128xf32, #tpu.memory_space<vmem>>, vector<2x128xf32>,
    return
  }
  func.func @transform_0(%arg0: i32, %arg1: i32) -> (i32, i32) {
    %c0_i32 = arith.constant 0 : i32
    return %arg1, %arg0 : i32, i32
  }
  func.func @transform_1(%arg0: i32, %arg1: i32) -> (i32, i32) {
    %c0_i32 = arith.constant 0 : i32
    %c0_i32_0 = arith.constant 0 : i32
    return %c0_i32, %arg0 : i32, i32
  }
  func.func @transform_2(%arg0: i32, %arg1: i32) -> (i32, i32) {
    %c0_i32 = arith.constant 0 : i32
    return %arg1, %arg0 : i32, i32
  }
}

</mosaic_0001>

<bundles_post_ra>
// kernel: tpu_custom_call.1
= control target key start
LH: loop header
LB: loop body
LE: loop exit
PB: predicated region body
PF: predicated region fallthrough
CT: control target
= control target key end

     0   :  { %7 = vsyncpa [#allocation3], 0  ;;  %s692_s0 = inlined_call_operand.hbm [shape: f32[2,256], index: 0, kind: input, shape index: {}]   ;;  %s693_s1 = inlined_call_operand.vmem [shape: f32[1,256], index: 1, kind: input, shape index: {}]   ;;  %s694_s2 = inlined_call_operand.hbm [shape: f32[2,256], index: 2, kind: output, shape index: {}]  }
   0x1   :  { %9 = vsyncpa [#allocation3 + $0x1], 0 }
   0x2   :  { %10 = vsyncpa [#allocation4], 0 }
   0x3   :  { %12 = vsyncpa [#allocation4 + $0x1], 0  ;;  %s515_s9 = smov 0   ;;  %s517_s10 = smov 0  }
   0x4   :  { %s519_s11 = smov 0   ;;  %s521_s12 = smov 0  }
   0x5   :  { %s523_s13 = smov 0   ;;  %s525_s14 = smov 0  }
   0x6 LB: > { %s308_s15 = sadd.s32 4294967295, %s496_s14   ;;  %s309_s16 = sadd.s32 4294967294, %s496_s14   ;;  %s496_s14 = sphi %s525_s14, %s18_s14   ;;  %s492_s13 = sphi %s523_s13, %s710_s13   ;;  %s488_s12 = sphi %s521_s12, %s709_s12   ;;  %s484_s11 = sphi %s519_s11, %s708_s11   ;;  %s480_s10 = sphi %s517_s10, %s707_s10   ;;  %s476_s9 = sphi %s515_s9, %s706_s9  }
   0x7   : > { %s30_s17 = sadd.s32 1, %s492_s13  ;;  %s39_s18 = sadd.s32 1, %s484_s11 }
   0x8   : > { %p32_p0 = scmp.ge.s32.totalorder %s30_s17, 2  ;;  %p46_p1 = scmp.ne.s32.totalorder %s484_s11, %s480_s10 }
   0x9   : > { %p47_p2 = scmp.eq.s32.totalorder %s496_s14, 0  ;;  %p52_p3 = scmp.ne.s32.totalorder %s480_s10, %s476_s9 }
   0xa   : > { %s712_s17 = smov (%p32_p0, %s30_s17), 0  ;;  %p53_p5 = scmp.eq.s32.totalorder %s308_s15, 0 }
   0xb   : > { %p556_p4 = por %p47_p2, %p46_p1  ;;  %s35_s20 = ssub.s32 %s492_s13, %s712_s17 }
   0xc   : > { %p104_p6 = scmp.eq.s32.totalorder %s308_s15, 1  ;;  %p37_p7 = scmp.eq.s32.totalorder %s35_s20, 0 }
   0xd   : > { %p562_p8 = por %p53_p5, %p52_p3  ;;  %p110_p10 = scmp.eq.s32.totalorder %s309_s16, 1 }
   0xe   : > { %p566_p9 = por %p104_p6, %p46_p1  ;;  %p334_p13 = scmp.lt.s32.totalorder %s496_s14, 2 }
   0xf   : > { %s571_s23 = scalar_select %p37_p7, %s484_s11, %s39_s18  }
  0x10   : > { %s698_s22 = scalar_select %p566_p9, 1, 0 }
  0x11   : > { %p573_p11 = por %p110_p10, %p52_p3  ;;  %s130_s25 = sand.u32 1, %s484_s11  }
  0x12   : > { %s312_s26 = sshll.u32 %s130_s25, 1  ;;  %s313_s27 = sshll.u32 %s492_s13, 5 }
  0x13   : > { %s699_s24 = scalar_select %p573_p11, 1, 0 }
  0x14   : > { %s584_s30 = scalar_lea.hbm %s692_s0, %s313_s27  ;;  %s134_s3 = scalar_lea.vmem [#allocation2], %s312_s26 }
  0x15   : > { %s143_s4 = sshll.u32 %s134_s3, 4  ;;  %p590_p0 = pnand %p334_p13, %p556_p4  ;;  %s586_s4 = int_to_ptr.vmem [resolvable:$true] %s143_s4 }
  0x16   : > { %s131_s6 = scalar_lea.sflag [#allocation3], %s130_s25  ;;  %s384_s7 = scalar_lea.hbm %s584_s30, 32 }
  0x17   : > { %p385_p3 = scmp.ne.s32.totalorder %s584_s30, %s384_s7  ;;  %p386_p5 = pneg %p590_p0 }
  0x18   : > { %s389_s16 = scalar_lea.hbm %s692_s0, 64  ;;  %p390_p4 = scmp.lt.u32.totalorder %s584_s30, %s692_s0 }
  0x19   : > { %p387_p6 = pnand %p386_p5, %p385_p3  ;;  %p391_p10 = scmp.lt.u32.totalorder %s389_s16, %s384_s7 }
  0x1a   : > { %p393_p12 = scmp.lt.u32.totalorder %s384_s7, %s584_s30 }
  0x1b   : > { %p388_p7 = pneg %p387_p6  ;;  %p392_p13 = por %p391_p10, %p390_p4 }
  0x1d   : > { %p394_p1 = por %p393_p12, %p392_p13 }
  0x1f   : > { %p395_p2 = pnand %p394_p1, %p388_p7 }
  0x21   : > { %398 = shalt.err (!%p395_p2)
}
  0x22   : > { %s399_s20 = scalar_lea.vmem %s586_s4, 32  ;;  %s498_s25 = smov [#allocation2]  }
  0x23   : > { %p400_p3 = scmp.ne.s32.totalorder %s586_s4, %s399_s20  ;;  %s404_s26 = sshll.u32 %s498_s25, 4  ;;  %s405_s26 = int_to_ptr.vmem [resolvable:$false] %s404_s26 }
  0x24   : > { %s406_s27 = scalar_lea.vmem %s405_s26, 64  ;;  %p407_p9 = scmp.lt.s32.totalorder %s586_s4, %s405_s26 }
  0x25   : > { %p402_p6 = pnand %p400_p3, %p386_p5  ;;  %p408_p4 = scmp.lt.s32.totalorder %s406_s27, %s399_s20 }
  0x27   : > { %p403_p11 = pneg %p402_p6  ;;  %p409_p10 = por %p408_p4, %p407_p9 }
  0x29   : > { %p410_p12 = pnand %p409_p10, %p403_p11 }
  0x2b   : > { %413 = shalt.err (!%p410_p12)
}
  0x2c   : > { %329 = dma.hbm_to_vmem [thread:$0]  (!%p590_p0), %s584_s30, 32, %s586_s4, %s131_s6  }
  0x2d   : > { %p701_p1 = scmp.lt.s32.totalorder %s496_s14, 3  ;;  %p702_p2 = scmp.ge.s32.totalorder %s496_s14, 1 }
  0x2f   : > { %p155_p5 = pnand %p702_p2, %p701_p1 }
  0x30   : > { %s626_s28 = sand.u32 (!%p155_p5), 1, %s480_s10  }
  0x31   : > { %158 = sbr.rel (%p155_p5) target bundleno = 85 (0x55), region = 28  ;;  %s315_s29 = sshll.u32 (!%p155_p5), %s626_s28, 1 }
  0x32   : > { %s161_s3 = scalar_lea.sflag (!%p155_p5), [#allocation3], %s626_s28  ;;  %s164_s7 = scalar_lea.vmem (!%p155_p5), [#allocation2], %s315_s29 }
  0x38   : > { %467 = dma.done.wait (%p562_p8), %s161_s3, 32  }
  0x39   : > { %469 = vsyncadd (%p562_p8), %s161_s3, 4294967264  ;;  %p188_p9 = scmp.lt.s32.totalorder %s488_s12, 1  ;;  %s187_s8 = scalar_lea.vmem [#allocation5], %s315_s29  ;;  %v191_v0 = vld [vmem:[%s164_s7] sm:$0x3] }
  0x3a   : > { %s217_s15 = sshll.u32 %s187_s8, 4  ;;  %s319_s16 = sshll.u32 %s488_s12, 5  ;;  %s640_s15 = int_to_ptr.vmem [resolvable:$true] %s217_s15 }
  0x3b   : > { %s189_s30 = scalar_select %p188_p9, %s488_s12, 1 }
  0x3c   : > { %s645_s19 = scalar_lea.hbm %s694_s2, %s319_s16  ;;  %s202_s20 = scalar_lea.sflag [#allocation4], %s626_s28 }
  0x3d   : > { %s190_s6 = scalar_lea.vmem %s693_s1, %s189_s30  ;;  %s414_s25 = scalar_lea.vmem %s640_s15, 32 }
  0x3e   : > { %v317_v1 = vld [vmem:[%s190_s6] ss:$0 sm:$0xff]  ;;  %p415_p8 = scmp.ne.s32.totalorder %s640_s15, %s414_s25  ;;  %p703_p11 = scmp.ne.s32.totalorder %s698_s22, 0 }
  0x3f   : > { %v199_v2 = vadd.f32 %v317_v1, %v191_v0  ;;  %s499_s12 = smov [#allocation5]  }
  0x40   : > { %p416_p0 = pnand %p415_p8, %p703_p11  ;;  %s418_s26 = sshll.u32 %s499_s12, 4  ;;  %s419_s26 = int_to_ptr.vmem [resolvable:$false] %s418_s26 }
  0x41   : > { %200 = vst [vmem:[%s187_s8] sm:$0x3] %v199_v2  ;;  %s420_s27 = scalar_lea.vmem %s419_s26, 64  ;;  %p421_p13 = scmp.lt.s32.totalorder %s640_s15, %s419_s26 }
  0x42   : > { %p417_p7 = pneg %p416_p0  ;;  %p422_p3 = scmp.lt.s32.totalorder %s420_s27, %s414_s25 }
  0x44   : > { %p423_p6 = por %p422_p3, %p421_p13 }
  0x46   : > { %p424_p4 = pnand %p423_p6, %p417_p7 }
  0x48   : > { %427 = shalt.err (!%p424_p4)
}
  0x49   : > { %s428_s28 = scalar_lea.hbm %s645_s19, 32  ;;  %s432_s7 = scalar_lea.hbm %s694_s2, 64 }
  0x4a   : > { %p429_p10 = scmp.ne.s32.totalorder %s645_s19, %s428_s28  ;;  %p433_p2 = scmp.lt.u32.totalorder %s645_s19, %s694_s2 }
  0x4b   : > { %p434_p5 = scmp.lt.u32.totalorder %s432_s7, %s428_s28  ;;  %p436_p8 = scmp.lt.u32.totalorder %s428_s28, %s645_s19 }
  0x4c   : > { %p430_p12 = pnand %p429_p10, %p703_p11 }
  0x4d   : > { %p435_p9 = por %p434_p5, %p433_p2 }
  0x4e   : > { %p431_p1 = pneg %p430_p12 }
  0x4f   : > { %p437_p0 = por %p436_p8, %p435_p9 }
  0x51   : > { %p438_p7 = pnand %p437_p0, %p431_p1 }
  0x53   : > { %441 = shalt.err (!%p438_p7)
}
  0x54   : > { %324 = dma.vmem_to_hbm [thread:$0]  (%p703_p11), %s640_s15, 32, %s645_s19, %s202_s20  }
  0x55 PF: > { %s229_s5 = sand.u32 1, %s476_s9   ;;  %p704_p13 = scmp.ne.s32.totalorder %s699_s24, 0 }
  0x56   : > { %p705_p3 = scmp.ge.s32.totalorder %s496_s14, 2  ;;  %s230_s6 = scalar_lea.sflag [#allocation4], %s229_s5 }
  0x58   : > { %p331_p6 = pnand %p705_p3, %p704_p13 }
  0x5a   : > { %471 = dma.done.wait (!%p331_p6), %s230_s6, 32  }
  0x5b   : > { %473 = vsyncadd (!%p331_p6), %s230_s6, 4294967264  ;;  %s18_s14 = sadd.s32 1, %s496_s14   ;;  %s706_s9 = smov %s480_s10 }
  0x5c   : > { %p15_p4 = scmp.ge.s32.totalorder %s18_s14, 4   ;;  %s707_s10 = smov %s484_s11 }
  0x5d   : > { %s708_s11 = smov %s571_s23  ;;  %s709_s12 = smov %s492_s13 }
  0x5e   : > { %s710_s13 = smov %s712_s17  ;;  %17 = sbr.rel (!%p15_p4) target bundleno = 6 (0x6), region = 76 }
  0x65   :  { %235 = vsyncpa [#allocation3], 1 }
  0x66   :  { %237 = vsyncpa [#allocation3 + $0x1], 1 }
  0x67   :  { %238 = vsyncpa [#allocation4], 1 }
  0x68   :  { %240 = vsyncpa [#allocation4 + $0x1], 1 }

</bundles_post_ra>
